<compile_context>
chip_gen: v6e
topology: v6e:2x2x1
jax: 0.10.0
libtpu: 0.0.40
codegen_flags: <defaults>
</compile_context>

<pallas_src>
import functools

import jax
import jax.numpy as jnp
from jax.experimental import pallas as pl
from jax.experimental.pallas import tpu as pltpu

ALPHA = 0.5
BETA = 0.5

LANES = 128
MAX_TM = 4096                      # max rows per grid step (multiple of 8)
VMEM_LIMIT = 32 * 1024 * 1024      # explicit scoped-VMEM limit (safe on v5e/v6e/v7x)


def _round_up(x, m):
    return (x + m - 1) // m * m


def _tversky_kernel(x_ref, t_ref, tp_ref, m_ref, *,
                    use_sigmoid, alpha, beta, tm, acc_rows,
                    nblocks, steps_per_core, has_overflow,
                    needs_row_mask, valid_rows_last):
    c = pl.program_id(0)           # core (parallel) axis
    j = pl.program_id(1)           # row-block (arbitrary) axis
    gb = c * steps_per_core + j    # global row-block index

    # Zero this core's resident partial-sum blocks on its first step.
    @pl.when(j == 0)
    def _():
        tp_ref[...] = jnp.zeros_like(tp_ref)
        m_ref[...] = jnp.zeros_like(m_ref)

    def accumulate(mask_rows):
        x = x_ref[...].astype(jnp.float32)
        t = t_ref[...].astype(jnp.float32)
        if use_sigmoid:
            # exp and approx reciprocal both land on the EUP slot,
            # keeping the VALU slots free for the cast + FMA stream.
            x = pl.reciprocal(1.0 + jnp.exp(-x), approx=True)
        tp_e = x * t
        m_e = alpha * x + beta * t
        if mask_rows:
            # Row-only mask for the ragged tail block (BlockSpec pad rows
            # are undefined).  (tm,1) iota -> broadcast over lanes.
            row_ids = jax.lax.broadcasted_iota(jnp.int32, (tm, 1), 0)
            valid = row_ids < valid_rows_last
            tp_e = jnp.where(valid, tp_e, 0.0)
            m_e = jnp.where(valid, m_e, 0.0)
        ngrp = tm // acc_rows
        tp_ref[0] += jnp.sum(tp_e.reshape(ngrp, acc_rows, LANES), axis=0)
        m_ref[0] += jnp.sum(m_e.reshape(ngrp, acc_rows, LANES), axis=0)

    if needs_row_mask:
        is_tail = gb == nblocks - 1
        main_cond = jnp.logical_not(is_tail)
        if has_overflow:
            main_cond = jnp.logical_and(gb < nblocks, main_cond)

        @pl.when(main_cond)
        def _():
            accumulate(mask_rows=False)

        @pl.when(is_tail)
        def _():
            accumulate(mask_rows=True)
    else:
        if has_overflow:
            @pl.when(gb < nblocks)
            def _():
                accumulate(mask_rows=False)
        else:
            accumulate(mask_rows=False)


def tversky_loss(inputs, targets, *, use_sigmoid=False,
                 smooth=1.0, alpha=ALPHA, beta=BETA):
    """Pallas TPU implementation of TverskyLoss.forward (returns scalar f32)."""
    alpha = float(alpha)
    beta = float(beta)
    smooth = float(smooth)

    x = jnp.reshape(inputs, (-1,))
    t = jnp.reshape(targets, (-1,))
    n = x.shape[0]

    # Lane pad only (<= 127 zeros); no-op for typical NCHW sizes.
    n_lane = _round_up(n, LANES)
    lane_pad = n_lane - n
    if lane_pad:
        x = jnp.pad(x, (0, lane_pad))
        t = jnp.pad(t, (0, lane_pad))

    rows = n_lane // LANES
    x2 = x.reshape(rows, LANES)
    t2 = t.reshape(rows, LANES)

    tm = min(MAX_TM, _round_up(rows, 8))
    nblocks = pl.cdiv(rows, tm)
    ncores = 2 if nblocks >= 2 else 1            # 2-way split for v7x megacore
    steps_per_core = pl.cdiv(nblocks, ncores)
    has_overflow = (ncores * steps_per_core) != nblocks

    valid_rows_last = rows - (nblocks - 1) * tm
    needs_row_mask = valid_rows_last != tm

    acc_rows = 64 if tm % 64 == 0 else 8         # small per-core accumulator

    kernel = functools.partial(
        _tversky_kernel,
        use_sigmoid=use_sigmoid, alpha=alpha, beta=beta,
        tm=tm, acc_rows=acc_rows, nblocks=nblocks,
        steps_per_core=steps_per_core, has_overflow=has_overflow,
        needs_row_mask=needs_row_mask, valid_rows_last=valid_rows_last)

    if has_overflow:
        def in_idx(c, j):
            # Clamp: overflow steps re-read the last block but contribute 0.
            return (jnp.minimum(c * steps_per_core + j, nblocks - 1), 0)
    else:
        def in_idx(c, j):
            return (c * steps_per_core + j, 0)

    tp_part, m_part = pl.pallas_call(
        kernel,
        out_shape=(
            jax.ShapeDtypeStruct((ncores, acc_rows, LANES), jnp.float32),
            jax.ShapeDtypeStruct((ncores, acc_rows, LANES), jnp.float32),
        ),
        grid_spec=pltpu.PrefetchScalarGridSpec(
            num_scalar_prefetch=0,
            grid=(ncores, steps_per_core),
            in_specs=[
                pl.BlockSpec((tm, LANES), in_idx),
                pl.BlockSpec((tm, LANES), in_idx),
            ],
            out_specs=[
                pl.BlockSpec((1, acc_rows, LANES), lambda c, j: (c, 0, 0)),
                pl.BlockSpec((1, acc_rows, LANES), lambda c, j: (c, 0, 0)),
            ],
        ),
        compiler_params=pltpu.CompilerParams(
            dimension_semantics=("parallel", "arbitrary"),
            vmem_limit_bytes=VMEM_LIMIT),
    )(x2, t2)

    # Combine per-core partials + final scalar math in the wrapper.
    tp = jnp.sum(tp_part)
    m = jnp.sum(m_part)
    if use_sigmoid and lane_pad:
        # Wrapper lane-pad zeros pass through sigmoid as 0.5 (target 0):
        # each adds alpha*0.5 to m and nothing to tp.  Remove analytically.
        m = m - alpha * 0.5 * lane_pad

    denom = (1.0 - alpha - beta) * tp + m + smooth
    return 1.0 - (tp + smooth) / denom


def _tversky_ref(inputs, targets, *, use_sigmoid=False,
                 smooth=1.0, alpha=ALPHA, beta=BETA):
    x = jnp.reshape(inputs, (-1,)).astype(jnp.float32)
    t = jnp.reshape(targets, (-1,)).astype(jnp.float32)
    if use_sigmoid:
        x = jax.nn.sigmoid(x)
    tp = jnp.sum(x * t)
    fp = jnp.sum((1.0 - t) * x)
    fn = jnp.sum(t * (1.0 - x))
    tversky = (tp + smooth) / (tp + alpha * fp + beta * fn + smooth)
    return 1.0 - tversky


if __name__ == "__main__":
    key = jax.random.PRNGKey(0)
    k1, k2, k3, k4, k5, k6 = jax.random.split(key, 6)

    # NCHW-shaped synthetic segmentation predictions / binary targets.
    x = jax.random.uniform(k1, (2, 4, 16, 16), dtype=jnp.float32)
    tgt = (jax.random.uniform(k2, (2, 4, 16, 16)) > 0.5).astype(jnp.float32)

    loss = tversky_loss(x, tgt, use_sigmoid=False)
    jax.block_until_ready(loss)
    ref = _tversky_ref(x, tgt, use_sigmoid=False)
    assert jnp.allclose(loss, ref, rtol=1e-5, atol=1e-5), (loss, ref)

    # Sigmoid path (EUP exp + approximate reciprocal in-kernel).
    loss_sig = tversky_loss(x, tgt, use_sigmoid=True)
    jax.block_until_ready(loss_sig)
    ref_sig = _tversky_ref(x, tgt, use_sigmoid=True)
    assert jnp.allclose(loss_sig, ref_sig, rtol=2e-3, atol=2e-3), (loss_sig, ref_sig)

    # Ragged size (not a multiple of 128) + native bf16 + sigmoid:
    # exercises the row mask and the analytic lane-pad correction.
    xr = jax.random.normal(k3, (2, 3, 7, 5), dtype=jnp.bfloat16)
    tr = (jax.random.uniform(k4, (2, 3, 7, 5)) > 0.5).astype(jnp.bfloat16)
    loss_r = tversky_loss(xr, tr, use_sigmoid=True)
    jax.block_until_ready(loss_r)
    ref_r = _tversky_ref(xr, tr, use_sigmoid=True)
    assert jnp.allclose(loss_r, ref_r, rtol=2e-3, atol=2e-3), (loss_r, ref_r)

    # Multi-block path: 2-core parallel split + ragged tail + overflow step.
    xb = jax.random.uniform(k5, (2, 36, 125, 128), dtype=jnp.float32)
    tb = (jax.random.uniform(k6, (2, 36, 125, 128)) > 0.5).astype(jnp.float32)
    loss_b = tversky_loss(xb, tb, use_sigmoid=False)
    jax.block_until_ready(loss_b)
    ref_b = _tversky_ref(xb, tb, use_sigmoid=False)
    assert jnp.allclose(loss_b, ref_b, rtol=2e-4, atol=2e-4), (loss_b, ref_b)

    print("KERNEL_OK")
</pallas_src>

<mosaic_0001>
module attributes {stable_mosaic.version = 11 : i64} {
  func.func @_tversky_kernel(%arg0: i32, %arg1: i32, %arg2: memref<16x128xf32, #tpu.memory_space<vmem>>, %arg3: memref<16x128xf32, #tpu.memory_space<vmem>>, %arg4: memref<1x8x128xf32, #tpu.memory_space<vmem>>, %arg5: memref<1x8x128xf32, #tpu.memory_space<vmem>>) attributes {dimension_semantics = [#tpu.dimension_semantics<parallel>, #tpu.dimension_semantics<arbitrary>], iteration_bounds = array<i64: 1, 1>, scalar_prefetch = 0 : i64, scratch_operands = 0 : i64, tpu.core_type = #tpu.core_type<tc>, window_params = [{transform_indices = @transform_0, window_bounds = array<i64: 16, 128>}, {transform_indices = @transform_1, window_bounds = array<i64: 16, 128>}, {transform_indices = @transform_2, window_bounds = array<i64: 1, 8, 128>}, {transform_indices = @transform_3, window_bounds = array<i64: 1, 8, 128>}]} {
    %c0_i32 = arith.constant 0 : i32
    %0 = arith.cmpi eq, %arg1, %c0_i32 : i32
    %1 = arith.extui %0 : i1 to i32
    %c0_i32_0 = arith.constant 0 : i32
    %2 = arith.cmpi ne, %1, %c0_i32_0 : i32
    scf.if %2 {
      %cst_19 = arith.constant 0.000000e+00 : f32
      %27 = vector.broadcast %cst_19 : f32 to vector<1x8x128xf32>
      %c0_20 = arith.constant 0 : index
      %c0_21 = arith.constant 0 : index
      %c0_22 = arith.constant 0 : index
      %28 = vector.load %arg4[%c0_20, %c0_21, %c0_22] : memref<1x8x128xf32, #tpu.memory_space<vmem>>, vector<1x8x128xf32>
      tpu.vector_store %arg4[%c0_20, %c0_21, %c0_22], %27 {strides = array<i32>} : memref<1x8x128xf32, #tpu.memory_space<vmem>>, vector<1x8x128xf32>,
      %cst_23 = arith.constant 0.000000e+00 : f32
      %29 = vector.broadcast %cst_23 : f32 to vector<1x8x128xf32>
      %c0_24 = arith.constant 0 : index
      %c0_25 = arith.constant 0 : index
      %c0_26 = arith.constant 0 : index
      %30 = vector.load %arg5[%c0_24, %c0_25, %c0_26] : memref<1x8x128xf32, #tpu.memory_space<vmem>>, vector<1x8x128xf32>
      tpu.vector_store %arg5[%c0_24, %c0_25, %c0_26], %29 {strides = array<i32>} : memref<1x8x128xf32, #tpu.memory_space<vmem>>, vector<1x8x128xf32>,
    } else {
    }
    %c0 = arith.constant 0 : index
    %c0_1 = arith.constant 0 : index
    %3 = vector.load %arg2[%c0, %c0_1] : memref<16x128xf32, #tpu.memory_space<vmem>>, vector<16x128xf32>
    %c0_2 = arith.constant 0 : index
    %c0_3 = arith.constant 0 : index
    %4 = vector.load %arg3[%c0_2, %c0_3] : memref<16x128xf32, #tpu.memory_space<vmem>>, vector<16x128xf32>
    %5 = arith.mulf %3, %4 : vector<16x128xf32>
    %cst = arith.constant 5.000000e-01 : f32
    %6 = vector.broadcast %cst : f32 to vector<16x128xf32>
    %7 = arith.mulf %6, %3 : vector<16x128xf32>
    %cst_4 = arith.constant 5.000000e-01 : f32
    %8 = vector.broadcast %cst_4 : f32 to vector<16x128xf32>
    %9 = arith.mulf %8, %4 : vector<16x128xf32>
    %10 = arith.addf %7, %9 : vector<16x128xf32>
    %c0_5 = arith.constant 0 : index
    %c0_6 = arith.constant 0 : index
    %c0_7 = arith.constant 0 : index
    %11 = vector.load %arg4[%c0_5, %c0_6, %c0_7] : memref<1x8x128xf32, #tpu.memory_space<vmem>>, vector<1x8x128xf32>
    %12 = vector.shape_cast %11 : vector<1x8x128xf32> to vector<8x128xf32>
    %13 = vector.shape_cast %5 : vector<16x128xf32> to vector<2x8x128xf32>
    %cst_8 = arith.constant dense<0.000000e+00> : vector<8x128xf32>
    %14 = vector.multi_reduction <add>, %13, %cst_8 [0] : vector<2x8x128xf32> to vector<8x128xf32>
    %15 = arith.addf %12, %14 : vector<8x128xf32>
    %c0_9 = arith.constant 0 : index
    %c0_10 = arith.constant 0 : index
    %c0_11 = arith.constant 0 : index
    %16 = vector.load %arg4[%c0_9, %c0_10, %c0_11] : memref<1x8x128xf32, #tpu.memory_space<vmem>>, vector<1x8x128xf32>
    %17 = vector.shape_cast %16 : vector<1x8x128xf32> to vector<8x128xf32>
    %18 = vector.shape_cast %15 : vector<8x128xf32> to vector<1x8x128xf32>
    tpu.vector_store %arg4[%c0_9, %c0_10, %c0_11], %18 {strides = array<i32>} : memref<1x8x128xf32, #tpu.memory_space<vmem>>, vector<1x8x128xf32>,
    %c0_12 = arith.constant 0 : index
    %c0_13 = arith.constant 0 : index
    %c0_14 = arith.constant 0 : index
    %19 = vector.load %arg5[%c0_12, %c0_13, %c0_14] : memref<1x8x128xf32, #tpu.memory_space<vmem>>, vector<1x8x128xf32>
    %20 = vector.shape_cast %19 : vector<1x8x128xf32> to vector<8x128xf32>
    %21 = vector.shape_cast %10 : vector<16x128xf32> to vector<2x8x128xf32>
    %cst_15 = arith.constant dense<0.000000e+00> : vector<8x128xf32>
    %22 = vector.multi_reduction <add>, %21, %cst_15 [0] : vector<2x8x128xf32> to vector<8x128xf32>
    %23 = arith.addf %20, %22 : vector<8x128xf32>
    %c0_16 = arith.constant 0 : index
    %c0_17 = arith.constant 0 : index
    %c0_18 = arith.constant 0 : index
    %24 = vector.load %arg5[%c0_16, %c0_17, %c0_18] : memref<1x8x128xf32, #tpu.memory_space<vmem>>, vector<1x8x128xf32>
    %25 = vector.shape_cast %24 : vector<1x8x128xf32> to vector<8x128xf32>
    %26 = vector.shape_cast %23 : vector<8x128xf32> to vector<1x8x128xf32>
    tpu.vector_store %arg5[%c0_16, %c0_17, %c0_18], %26 {strides = array<i32>} : memref<1x8x128xf32, #tpu.memory_space<vmem>>, vector<1x8x128xf32>,
    return
  }
  func.func @transform_0(%arg0: i32, %arg1: i32) -> (i32, i32) {
    %c1_i32 = arith.constant 1 : i32
    %0 = arith.muli %arg0, %c1_i32 : i32
    %1 = arith.addi %0, %arg1 : i32
    %c0_i32 = arith.constant 0 : i32
    %c0_i32_0 = arith.constant 0 : i32
    return %1, %c0_i32 : i32, i32
  }
  func.func @transform_1(%arg0: i32, %arg1: i32) -> (i32, i32) {
    %c1_i32 = arith.constant 1 : i32
    %0 = arith.muli %arg0, %c1_i32 : i32
    %1 = arith.addi %0, %arg1 : i32
    %c0_i32 = arith.constant 0 : i32
    %c0_i32_0 = arith.constant 0 : i32
    return %1, %c0_i32 : i32, i32
  }
  func.func @transform_2(%arg0: i32, %arg1: i32) -> (i32, i32, i32) {
    %c0_i32 = arith.constant 0 : i32
    %c0_i32_0 = arith.constant 0 : i32
    %c0_i32_1 = arith.constant 0 : i32
    return %arg0, %c0_i32, %c0_i32_0 : i32, i32, i32
  }
  func.func @transform_3(%arg0: i32, %arg1: i32) -> (i32, i32, i32) {
    %c0_i32 = arith.constant 0 : i32
    %c0_i32_0 = arith.constant 0 : i32
    %c0_i32_1 = arith.constant 0 : i32
    return %arg0, %c0_i32, %c0_i32_0 : i32, i32, i32
  }
}

</mosaic_0001>

<bundles_post_ra>
// kernel: tpu_custom_call.1
= control target key start
LH: loop header
LB: loop body
LE: loop exit
PB: predicated region body
PF: predicated region fallthrough
CT: control target
= control target key end

     0   :  { %9 = vsyncpa [#allocation3], 0  ;;  %s244_s0 = inlined_call_operand.hbm [shape: f32[16,128], index: 0, kind: input, shape index: {}]   ;;  %s245_s1 = inlined_call_operand.hbm [shape: f32[16,128], index: 1, kind: input, shape index: {}]   ;;  %s246_s2 = inlined_call_operand.hbm [shape: f32[1,8,128], index: 2, kind: output, shape index: {0}]   ;;  %s247_s3 = inlined_call_operand.hbm [shape: f32[1,8,128], index: 3, kind: output, shape index: {1}]  }
   0x1   :  { %10 = vsyncpa [#allocation6], 0 }
   0x2   :  { %11 = vsyncpa [#allocation4], 0 }
   0x3   :  { %12 = vsyncpa [#allocation9], 0  ;;  %s206_s12 = smov [#allocation2]  }
   0x4   :  { %s22_s13 = sshll.u32 %s206_s12, 4  ;;  %s23_s13 = int_to_ptr.vmem [resolvable:$true] %s22_s13 }
   0x5   :  { %s126_s14 = scalar_lea.vmem %s23_s13, 256  ;;  %p131_p1 = scmp.lt.s32.totalorder %s23_s13, %s23_s13 }
   0x6   :  { %p127_p0 = scmp.ne.s32.totalorder %s23_s13, %s126_s14  ;;  %p132_p2 = scmp.lt.s32.totalorder %s126_s14, %s126_s14 }
   0x8   :  { %p133_p3 = por %p132_p2, %p131_p1 }
   0xa   :  { %p134_p4 = pnand %p133_p3, %p127_p0 }
   0xc   :  { %137 = shalt.err (!%p134_p4)
}
   0xd   :  { %s207_s15 = smov 128   ;;  %s208_s16 = smov 8  }
   0xe   :  { %28 = dma.hbm_to_vmem [thread:$0]  %s244_s0, 256, %s23_s13, [#allocation3], %s207_s15, %s207_s15, %s208_s16  }
   0xf   :  { %s209_s19 = smov [#allocation5]  }
  0x10   :  { %s38_s20 = sshll.u32 %s209_s19, 4  ;;  %s39_s20 = int_to_ptr.vmem [resolvable:$true] %s38_s20 }
  0x11   :  { %s146_s21 = scalar_lea.vmem %s39_s20, 256  ;;  %p151_p6 = scmp.lt.s32.totalorder %s39_s20, %s39_s20 }
  0x12   :  { %p147_p5 = scmp.ne.s32.totalorder %s39_s20, %s146_s21  ;;  %p152_p7 = scmp.lt.s32.totalorder %s146_s21, %s146_s21 }
  0x14   :  { %p153_p8 = por %p152_p7, %p151_p6 }
  0x16   :  { %p154_p9 = pnand %p153_p8, %p147_p5 }
  0x18   :  { %157 = shalt.err (!%p154_p9)
}
  0x19   :  { %44 = dma.hbm_to_vmem [thread:$0]  %s245_s1, 256, %s39_s20, [#allocation6], %s207_s15, %s207_s15, %s208_s16  }
  0x1a   :  { %198 = dma.done.wait [#allocation3], 256  }
  0x1b   :  { %199 = vsyncadd [#allocation3], 4294967040 }
  0x1c   :  { %200 = dma.done.wait [#allocation6], 256  }
  0x1d   :  { %201 = vsyncadd [#allocation6], 4294967040  ;;  %v61_v0 = vld [vmem:[#allocation2] sm:$0xff]  ;;  %v62_v1 = vld [vmem:[#allocation2 + $0x8] sm:$0xff]  ;;  %s210_s0 = smov [#allocation7]   ;;  %s211_s1 = smov [#allocation8]  }
  0x1e   :  { %v63_v2 = vld [vmem:[#allocation5] sm:$0xff]  ;;  %v64_v3 = vld [vmem:[#allocation5 + $0x8] sm:$0xff]  ;;  %v67_v5 = vmul.f32 0.5, %v61_v0  ;;  %v68_v6 = vmul.f32 0.5, %v62_v1  ;;  %s87_s24 = sshll.u32 %s210_s0, 4  ;;  %s97_s25 = sshll.u32 %s211_s1, 4  ;;  %s88_s24 = int_to_ptr.vmem [resolvable:$true] %s87_s24  ;;  %s98_s25 = int_to_ptr.vmem [resolvable:$true] %s97_s25 }
  0x1f   :  { %v65_v4 = vmul.f32 %v63_v2, %v61_v0  ;;  %v69_v7 = vmul.f32 0.5, %v63_v2  ;;  %v66_v8 = vmul.f32 %v64_v3, %v62_v1  ;;  %v70_v9 = vmul.f32 0.5, %v64_v3  ;;  %s158_s26 = scalar_lea.vmem %s88_s24, 128  ;;  %p163_p11 = scmp.lt.s32.totalorder %s88_s24, %s88_s24 }
  0x20   :  { %p159_p10 = scmp.ne.s32.totalorder %s88_s24, %s158_s26  ;;  %p164_p12 = scmp.lt.s32.totalorder %s158_s26, %s158_s26 }
  0x21   :  { %v71_v10 = vadd.f32 %v69_v7, %v67_v5  ;;  %v74_v11 = vadd.f32 %v66_v8, %v65_v4  ;;  %v72_v12 = vadd.f32 %v70_v9, %v68_v6 }
  0x22   :  { %p165_p13 = por %p164_p12, %p163_p11 }
  0x23   :  { %v78_v13 = vadd.f32 %v72_v12, %v71_v10  ;;  %76 = vst [vmem:[#allocation7] sm:$0xff] %v74_v11 }
  0x24   :  { %p166_p0 = pnand %p165_p13, %p159_p10 }
  0x26   :  { %169 = shalt.err (!%p166_p0)
}
  0x27   :  { %90 = dma.vmem_to_hbm [thread:$0]  %s88_s24, 128, %s246_s2, [#allocation4]   ;;  %80 = vst [vmem:[#allocation8] sm:$0xff] %v78_v13 }
  0x28   :  { %s178_s29 = scalar_lea.vmem %s98_s25, 128  ;;  %p183_p2 = scmp.lt.s32.totalorder %s98_s25, %s98_s25 }
  0x29   :  { %p179_p1 = scmp.ne.s32.totalorder %s98_s25, %s178_s29  ;;  %p184_p3 = scmp.lt.s32.totalorder %s178_s29, %s178_s29 }
  0x2b   :  { %p185_p4 = por %p184_p3, %p183_p2 }
  0x2d   :  { %p186_p5 = pnand %p185_p4, %p179_p1 }
  0x2f   :  { %189 = shalt.err (!%p186_p5)
}
  0x30   :  { %100 = dma.vmem_to_hbm [thread:$0]  %s98_s25, 128, %s247_s3, [#allocation9]  }
  0x31   :  { %202 = dma.done.wait [#allocation4], 128  }
  0x32   :  { %203 = vsyncadd [#allocation4], 4294967168 }
  0x33   :  { %204 = dma.done.wait [#allocation9], 128  }
  0x34   :  { %205 = vsyncadd [#allocation9], 4294967168 }
  0x35   :  { %107 = vsyncpa [#allocation3], 1 }
  0x36   :  { %108 = vsyncpa [#allocation6], 1 }
  0x37   :  { %109 = vsyncpa [#allocation4], 1 }
  0x38   :  { %110 = vsyncpa [#allocation9], 1 }

</bundles_post_ra>
